<compile_context>
chip_gen: v6e
topology: v6e:2x2x1
jax: 0.10.0
libtpu: 0.0.40
codegen_flags: <defaults>
</compile_context>

<pallas_src>
import jax
import jax.numpy as jnp
from jax.experimental import pallas as pl
from jax.experimental.pallas import tpu as pltpu

K_IN = 28 * 28          # 784
K_PAD = 896             # 7 * 128, lane-aligned K
HID = 256
N_OUT = 10
OUT_PAD = 128           # lane-dense classifier width
MAX_TB = 1024           # batch tile cap (safe for v7x's 64 MiB VMEM)


def _mlp_kernel(x_ref, w1_ref, b1_ref, w2_ref, b2_ref, out_ref):
    # x_ref:  (TB, 896) bf16      w1_ref: (896, 256) bf16   b1_ref: (1, 256) f32
    # w2_ref: (256, 128) bf16     b2_ref: (1, 128) f32      out_ref: (TB, 128) f32

    # Linear(784 -> 256) + ReLU  (bf16 MXU matmul, f32 accumulation)
    h = jnp.dot(x_ref[...], w1_ref[...], preferred_element_type=jnp.float32)
    h = jnp.maximum(h + b1_ref[...], 0.0)

    # Linear(256 -> 128-padded)  (padded weight columns are zero)
    logits = jnp.dot(h.astype(jnp.bfloat16), w2_ref[...],
                     preferred_element_type=jnp.float32)
    logits = logits + b2_ref[...]   # padded bias lanes are -1e30 -> exp == 0

    # Softmax over the full 128 lanes (padded lanes contribute 0 to the denom).
    # Exact f32 reciprocal: one divide per row, then broadcast multiply.
    m = jnp.max(logits, axis=-1, keepdims=True)
    e = jnp.exp(logits - m)
    denom = jnp.sum(e, axis=-1, keepdims=True)
    inv = 1.0 / denom                                   # exact, (TB, 1)
    out_ref[...] = (e * inv).astype(out_ref.dtype)


def feed_forward_net(x_nchw, w1, b1, w2, b2):
    """Forward pass of FeedForwardNet.

    x_nchw: (B, 1, 28, 28) float32  (PyTorch NCHW)
    w1: (784, 256), b1: (256,), w2: (256, 10), b2: (10,)
    returns: (B, 10) softmax probabilities
    """
    B = x_nchw.shape[0]
    x = x_nchw.reshape(B, K_IN).astype(jnp.float32)          # nn.Flatten()
    x = jnp.pad(x, ((0, 0), (0, K_PAD - K_IN)))               # K: 784 -> 896

    # Batch tiling: tile must be a multiple of 8 (sublane); weights resident.
    b8 = ((B + 7) // 8) * 8
    tb = min(MAX_TB, b8)
    bp = pl.cdiv(B, tb) * tb
    if bp != B:
        x = jnp.pad(x, ((0, bp - B), (0, 0)))
    x = x.astype(jnp.bfloat16)

    # Weight / bias prep (bf16 matmul operands, f32 biases).
    w1p = jnp.pad(w1.astype(jnp.float32),
                  ((0, K_PAD - K_IN), (0, 0))).astype(jnp.bfloat16)
    b1_2d = b1.reshape(1, HID).astype(jnp.float32)
    w2p = jnp.pad(w2.astype(jnp.float32),
                  ((0, 0), (0, OUT_PAD - N_OUT))).astype(jnp.bfloat16)
    b2p = jnp.concatenate(
        [b2.astype(jnp.float32),
         jnp.full((OUT_PAD - N_OUT,), -1e30, jnp.float32)]).reshape(1, OUT_PAD)

    grid = (bp // tb,)
    cost = pl.CostEstimate(
        flops=2 * bp * K_PAD * HID + 2 * bp * HID * OUT_PAD,
        transcendentals=bp * OUT_PAD,
        bytes_accessed=(bp * K_PAD * 2 + K_PAD * HID * 2
                        + HID * OUT_PAD * 2 + bp * OUT_PAD * 4),
    )

    out = pl.pallas_call(
        _mlp_kernel,
        out_shape=jax.ShapeDtypeStruct((bp, OUT_PAD), jnp.float32),
        grid=grid,
        in_specs=[
            pl.BlockSpec((tb, K_PAD), lambda i: (i, 0)),      # x: tiled over batch
            pl.BlockSpec((K_PAD, HID), lambda i: (0, 0)),     # w1: resident
            pl.BlockSpec((1, HID), lambda i: (0, 0)),         # b1: resident
            pl.BlockSpec((HID, OUT_PAD), lambda i: (0, 0)),   # w2: resident
            pl.BlockSpec((1, OUT_PAD), lambda i: (0, 0)),     # b2: resident
        ],
        out_specs=pl.BlockSpec((tb, OUT_PAD), lambda i: (i, 0)),
        compiler_params=pltpu.CompilerParams(
            dimension_semantics=("parallel",)),
        cost_estimate=cost,
    )(x, w1p, b1_2d, w2p, b2p)

    return out[:B, :N_OUT]


def _init_params(key):
    """Deterministic parameter init (PyTorch nn.Linear-style uniform)."""
    k1, k2, k3, k4 = jax.random.split(key, 4)
    bound1 = 1.0 / jnp.sqrt(K_IN)
    w1 = jax.random.uniform(k1, (K_IN, HID), jnp.float32, -bound1, bound1)
    b1 = jax.random.uniform(k2, (HID,), jnp.float32, -bound1, bound1)

    bound2 = 1.0 / jnp.sqrt(HID)
    w2 = jax.random.uniform(k3, (HID, N_OUT), jnp.float32, -bound2, bound2)
    b2 = jax.random.uniform(k4, (N_OUT,), jnp.float32, -bound2, bound2)
    return w1, b1, w2, b2


if __name__ == "__main__":
    key = jax.random.PRNGKey(0)
    k_x, k_p = jax.random.split(key)

    B = 8
    x = jax.random.normal(k_x, (B, 1, 28, 28), jnp.float32)  # NCHW, like MNIST
    w1, b1, w2, b2 = _init_params(k_p)

    probs = feed_forward_net(x, w1, b1, w2, b2)
    probs = jax.block_until_ready(probs)

    # Reference with the same bf16 matmul operands / f32 accumulation.
    x_flat = x.reshape(B, -1)
    h_ref = jnp.dot(x_flat.astype(jnp.bfloat16), w1.astype(jnp.bfloat16),
                    preferred_element_type=jnp.float32) + b1
    h_ref = jnp.maximum(h_ref, 0.0)
    logits_ref = jnp.dot(h_ref.astype(jnp.bfloat16), w2.astype(jnp.bfloat16),
                         preferred_element_type=jnp.float32) + b2
    ref = jax.nn.softmax(logits_ref, axis=1)

    assert probs.shape == (B, N_OUT)
    assert jnp.allclose(jnp.sum(probs, axis=1), 1.0, atol=2e-3)
    assert jnp.allclose(probs, ref, atol=2e-3)

    print("KERNEL_OK")
</pallas_src>

<mosaic_0001>
module attributes {stable_mosaic.version = 11 : i64} {
  func.func @_mlp_kernel(%arg0: i32, %arg1: memref<8x896xbf16, #tpu.memory_space<vmem>>, %arg2: memref<896x256xbf16, #tpu.memory_space<vmem>>, %arg3: memref<1x256xf32, #tpu.memory_space<vmem>>, %arg4: memref<256x128xbf16, #tpu.memory_space<vmem>>, %arg5: memref<1x128xf32, #tpu.memory_space<vmem>>, %arg6: memref<8x128xf32, #tpu.memory_space<vmem>>) attributes {dimension_semantics = [#tpu.dimension_semantics<parallel>], iteration_bounds = array<i64: 1>, scalar_prefetch = 0 : i64, scratch_operands = 0 : i64, tpu.core_type = #tpu.core_type<tc>, window_params = [{transform_indices = @transform_0, window_bounds = array<i64: 8, 896>}, {pipeline_mode = #tpu.pipeline_mode<synchronous>, transform_indices = @transform_1, window_bounds = array<i64: 896, 256>}, {pipeline_mode = #tpu.pipeline_mode<synchronous>, transform_indices = @transform_2, window_bounds = array<i64: 1, 256>}, {pipeline_mode = #tpu.pipeline_mode<synchronous>, transform_indices = @transform_3, window_bounds = array<i64: 256, 128>}, {pipeline_mode = #tpu.pipeline_mode<synchronous>, transform_indices = @transform_4, window_bounds = array<i64: 1, 128>}, {transform_indices = @transform_5, window_bounds = array<i64: 8, 128>}]} {
    %c0 = arith.constant 0 : index
    %c0_0 = arith.constant 0 : index
    %0 = vector.load %arg1[%c0, %c0_0] : memref<8x896xbf16, #tpu.memory_space<vmem>>, vector<8x896xbf16>
    %c0_1 = arith.constant 0 : index
    %c0_2 = arith.constant 0 : index
    %1 = vector.load %arg2[%c0_1, %c0_2] : memref<896x256xbf16, #tpu.memory_space<vmem>>, vector<896x256xbf16>
    %cst = arith.constant dense<0.000000e+00> : vector<8x256xf32>
    %2 = tpu.matmul %0, %1, %cst {dimension_numbers = #tpu.dot_dimension_numbers<[1], [0], [0], [1], [0, 0, 1, 1], [], []>} : vector<8x896xbf16>, vector<896x256xbf16>, vector<8x256xf32> -> vector<8x256xf32>
    %c0_3 = arith.constant 0 : index
    %c0_4 = arith.constant 0 : index
    %3 = vector.load %arg3[%c0_3, %c0_4] : memref<1x256xf32, #tpu.memory_space<vmem>>, vector<1x256xf32>
    %4 = vector.broadcast %3 : vector<1x256xf32> to vector<8x256xf32>
    %5 = arith.addf %2, %4 : vector<8x256xf32>
    %cst_5 = arith.constant 0.000000e+00 : f32
    %6 = vector.broadcast %cst_5 : f32 to vector<8x256xf32>
    %7 = arith.maximumf %5, %6 : vector<8x256xf32>
    %8 = arith.truncf %7 : vector<8x256xf32> to vector<8x256xbf16>
    %c0_6 = arith.constant 0 : index
    %c0_7 = arith.constant 0 : index
    %9 = vector.load %arg4[%c0_6, %c0_7] : memref<256x128xbf16, #tpu.memory_space<vmem>>, vector<256x128xbf16>
    %cst_8 = arith.constant dense<0.000000e+00> : vector<8x128xf32>
    %10 = tpu.matmul %8, %9, %cst_8 {dimension_numbers = #tpu.dot_dimension_numbers<[1], [0], [0], [1], [0, 0, 1, 1], [], []>} : vector<8x256xbf16>, vector<256x128xbf16>, vector<8x128xf32> -> vector<8x128xf32>
    %c0_9 = arith.constant 0 : index
    %c0_10 = arith.constant 0 : index
    %11 = vector.load %arg5[%c0_9, %c0_10] : memref<1x128xf32, #tpu.memory_space<vmem>>, vector<1x128xf32>
    %12 = vector.broadcast %11 : vector<1x128xf32> to vector<8x128xf32>
    %13 = arith.addf %10, %12 : vector<8x128xf32>
    %cst_11 = arith.constant dense<0xFF800000> : vector<8xf32>
    %14 = vector.multi_reduction <maximumf>, %13, %cst_11 [1] : vector<8x128xf32> to vector<8xf32>
    %15 = vector.shape_cast %14 : vector<8xf32> to vector<8x1xf32>
    %16 = vector.broadcast %15 : vector<8x1xf32> to vector<8x128xf32>
    %17 = arith.subf %13, %16 : vector<8x128xf32>
    %18 = math.exp %17 : vector<8x128xf32>
    %cst_12 = arith.constant dense<0.000000e+00> : vector<8xf32>
    %19 = vector.multi_reduction <add>, %18, %cst_12 [1] : vector<8x128xf32> to vector<8xf32>
    %20 = vector.shape_cast %19 : vector<8xf32> to vector<8x1xf32>
    %cst_13 = arith.constant 1.000000e+00 : f32
    %21 = vector.broadcast %cst_13 : f32 to vector<8x1xf32>
    %22 = arith.divf %21, %20 : vector<8x1xf32>
    %23 = vector.broadcast %22 : vector<8x1xf32> to vector<8x128xf32>
    %24 = arith.mulf %18, %23 : vector<8x128xf32>
    %c0_14 = arith.constant 0 : index
    %c0_15 = arith.constant 0 : index
    %25 = vector.load %arg6[%c0_14, %c0_15] : memref<8x128xf32, #tpu.memory_space<vmem>>, vector<8x128xf32>
    tpu.vector_store %arg6[%c0_14, %c0_15], %24 {strides = array<i32>} : memref<8x128xf32, #tpu.memory_space<vmem>>, vector<8x128xf32>,
    return
  }
  func.func @transform_0(%arg0: i32) -> (i32, i32) {
    %c0_i32 = arith.constant 0 : i32
    %c0_i32_0 = arith.constant 0 : i32
    return %arg0, %c0_i32 : i32, i32
  }
  func.func @transform_1(%arg0: i32) -> (i32, i32) {
    %c0_i32 = arith.constant 0 : i32
    %c0_i32_0 = arith.constant 0 : i32
    %c0_i32_1 = arith.constant 0 : i32
    return %c0_i32, %c0_i32_0 : i32, i32
  }
  func.func @transform_2(%arg0: i32) -> (i32, i32) {
    %c0_i32 = arith.constant 0 : i32
    %c0_i32_0 = arith.constant 0 : i32
    %c0_i32_1 = arith.constant 0 : i32
    return %c0_i32, %c0_i32_0 : i32, i32
  }
  func.func @transform_3(%arg0: i32) -> (i32, i32) {
    %c0_i32 = arith.constant 0 : i32
    %c0_i32_0 = arith.constant 0 : i32
    %c0_i32_1 = arith.constant 0 : i32
    return %c0_i32, %c0_i32_0 : i32, i32
  }
  func.func @transform_4(%arg0: i32) -> (i32, i32) {
    %c0_i32 = arith.constant 0 : i32
    %c0_i32_0 = arith.constant 0 : i32
    %c0_i32_1 = arith.constant 0 : i32
    return %c0_i32, %c0_i32_0 : i32, i32
  }
  func.func @transform_5(%arg0: i32) -> (i32, i32) {
    %c0_i32 = arith.constant 0 : i32
    %c0_i32_0 = arith.constant 0 : i32
    return %arg0, %c0_i32 : i32, i32
  }
}

</mosaic_0001>

<bundles_post_ra>
// kernel: tpu_custom_call.1
= control target key start
LH: loop header
LB: loop body
LE: loop exit
PB: predicated region body
PF: predicated region fallthrough
CT: control target
= control target key end

     0   :  { %10 = vsyncpa [#allocation3], 0  ;;  %s1655_s0 = inlined_call_operand.hbm [shape: bf16[8,896], index: 0, kind: input, shape index: {}]   ;;  %s1656_s1 = inlined_call_operand.hbm [shape: bf16[896,256], index: 1, kind: input, shape index: {}]   ;;  %s1657_s2 = inlined_call_operand.vmem [shape: f32[1,256], index: 2, kind: input, shape index: {}]   ;;  %s1658_s3 = inlined_call_operand.hbm [shape: bf16[256,128], index: 3, kind: input, shape index: {}]   ;;  %s1659_s4 = inlined_call_operand.vmem [shape: f32[1,128], index: 4, kind: input, shape index: {}]   ;;  %s1660_s5 = inlined_call_operand.hbm [shape: f32[8,128], index: 5, kind: output, shape index: {}]  }
   0x1   :  { %11 = vsyncpa [#allocation6], 0 }
   0x2   :  { %12 = vsyncpa [#allocation4], 0  ;;  %s1592_s18 = smov [#allocation5]  }
   0x3   :  { %s28_s19 = sshll.u32 %s1592_s18, 4  ;;  %s29_s19 = int_to_ptr.vmem [resolvable:$true] %s28_s19 }
   0x4   :  { %s1514_s20 = scalar_lea.vmem %s29_s19, 14336  ;;  %p1519_p1 = scmp.lt.s32.totalorder %s29_s19, %s29_s19 }
   0x5   :  { %p1515_p0 = scmp.ne.s32.totalorder %s29_s19, %s1514_s20  ;;  %p1520_p2 = scmp.lt.s32.totalorder %s1514_s20, %s1514_s20 }
   0x7   :  { %p1521_p3 = por %p1520_p2, %p1519_p1 }
   0x9   :  { %p1522_p4 = pnand %p1521_p3, %p1515_p0 }
   0xb   :  { %1525 = shalt.err (!%p1522_p4)
}
   0xc   :  { %s1593_s21 = smov 128   ;;  %s1594_s22 = smov 8  }
   0xd   :  { %34 = dma.hbm_to_vmem [thread:$0]  %s1656_s1, 14336, %s29_s19, [#allocation6], %s1593_s21, %s1593_s21, %s1594_s22  }
   0xe   :  { %s1595_s25 = smov [#allocation2]   ;;  %s1596_s27 = smov [#allocation7]  }
   0xf   :  { %s19_s26 = sshll.u32 %s1595_s25, 4  ;;  %s42_s28 = sshll.u32 %s1596_s27, 4  ;;  %s20_s26 = int_to_ptr.vmem [resolvable:$true] %s19_s26  ;;  %s43_s28 = int_to_ptr.vmem [resolvable:$true] %s42_s28 }
  0x10   :  { %s1534_s29 = scalar_lea.vmem %s20_s26, 448  ;;  %p1539_p6 = scmp.lt.s32.totalorder %s20_s26, %s20_s26 }
  0x11   :  { %p1535_p5 = scmp.ne.s32.totalorder %s20_s26, %s1534_s29  ;;  %p1540_p7 = scmp.lt.s32.totalorder %s1534_s29, %s1534_s29 }
  0x13   :  { %p1541_p8 = por %p1540_p7, %p1539_p6 }
  0x15   :  { %p1542_p9 = pnand %p1541_p8, %p1535_p5 }
  0x17   :  { %1545 = shalt.err (!%p1542_p9)
}
  0x18   :  { %22 = dma.hbm_to_vmem [thread:$0]  %s1655_s0, 448, %s20_s26, [#allocation3]  }
  0x19   :  { %s1554_s7 = scalar_lea.vmem %s43_s28, 2048  ;;  %p1559_p11 = scmp.lt.s32.totalorder %s43_s28, %s43_s28 }
  0x1a   :  { %p1555_p10 = scmp.ne.s32.totalorder %s43_s28, %s1554_s7  ;;  %p1560_p12 = scmp.lt.s32.totalorder %s1554_s7, %s1554_s7 }
  0x1c   :  { %p1561_p13 = por %p1560_p12, %p1559_p11 }
  0x1e   :  { %p1562_p0 = pnand %p1561_p13, %p1555_p10 }
  0x20   :  { %1565 = shalt.err (!%p1562_p0)
}
  0x21   :  { %s1597_s1 = smov 64   ;;  %s1598_s8 = smov 4  }
  0x22   :  { %48 = dma.hbm_to_vmem [thread:$0]  %s1658_s3, 2048, %s43_s28, [#allocation6], %s1597_s1, %s1597_s1, %s1598_s8  }
  0x23   :  { %1586 = dma.done.wait [#allocation3], 448  }
  0x24   :  { %1587 = vsyncadd [#allocation3], 4294966848 }
  0x25   :  { %1588 = dma.done.wait [#allocation6], 16384  }
  0x26   :  { %1589 = vsyncadd [#allocation6], 4294950912  ;;  %v1311_v0 = vld [vmem:[#allocation5 + $0x74] ss:$8 sps:$4 sm:$0xff]   ;;  %v1313_v1 = vld [vmem:[#allocation5 + $0x70] ss:$8 sps:$4 sm:$0xff]  }
  0x27   :  { %774 = vmatprep.subr.bf16.mxu0 %v1311_v0  ;;  %v1314_v2 = vld [vmem:[#allocation5 + $0x174] ss:$8 sps:$4 sm:$0xff]   ;;  %v1316_v3 = vld [vmem:[#allocation5 + $0x170] ss:$8 sps:$4 sm:$0xff]   ;;  %v1317_v4 = vld [vmem:[#allocation5 + $0x64] ss:$8 sps:$4 sm:$0xff]  }
  0x28   :  { %775 = vmatpush1.bf16.msra.mxu0 %v1313_v1  ;;  %v1319_v5 = vld [vmem:[#allocation5 + $0x60] ss:$8 sps:$4 sm:$0xff]   ;;  %815 = vmatprep.subr.bf16.mxu1 %v1314_v2  ;;  %v1320_v6 = vld [vmem:[#allocation5 + $0x164] ss:$8 sps:$4 sm:$0xff]   ;;  %v1323_v8 = vld [vmem:[#allocation5 + $0x54] ss:$8 sps:$4 sm:$0xff]  }
  0x29   :  { %816 = vmatpush1.bf16.msra.mxu1 %v1316_v3  ;;  %776 = vmatprep.subr.bf16.mxu0 %v1317_v4  ;;  %v1322_v7 = vld [vmem:[#allocation5 + $0x160] ss:$8 sps:$4 sm:$0xff]   ;;  %v1325_v9 = vld [vmem:[#allocation5 + $0x50] ss:$8 sps:$4 sm:$0xff]   ;;  %v1326_v10 = vld [vmem:[#allocation5 + $0x154] ss:$8 sps:$4 sm:$0xff]  }
  0x2a   :  { %817 = vmatprep.subr.bf16.mxu1 %v1320_v6  ;;  %v1329_v11 = vld [vmem:[#allocation5 + $0x44] ss:$8 sps:$4 sm:$0xff]   ;;  %v1328_v12 = vld [vmem:[#allocation5 + $0x150] ss:$8 sps:$4 sm:$0xff]   ;;  %v1331_v14 = vld [vmem:[#allocation5 + $0x40] ss:$8 sps:$4 sm:$0xff]  }
  0x2b   :  { %v1332_v13 = vld [vmem:[#allocation5 + $0x144] ss:$8 sps:$4 sm:$0xff]   ;;  %v1335_v15 = vld [vmem:[#allocation5 + $0x34] ss:$8 sps:$4 sm:$0xff]   ;;  %v1334_v16 = vld [vmem:[#allocation5 + $0x140] ss:$8 sps:$4 sm:$0xff]  }
  0x2c   :  { %777 = vmatpush1.bf16.msra.mxu0 %v1319_v5  ;;  %v1338_v17 = vld [vmem:[#allocation5 + $0x134] ss:$8 sps:$4 sm:$0xff]   ;;  %v1337_v18 = vld [vmem:[#allocation5 + $0x30] ss:$8 sps:$4 sm:$0xff]   ;;  %v1341_v19 = vld [vmem:[#allocation5 + $0x24] ss:$8 sps:$4 sm:$0xff]  }
  0x2d   :  { %778 = vmatprep.subr.bf16.mxu0 %v1323_v8  ;;  %818 = vmatpush1.bf16.msra.mxu1 %v1322_v7  ;;  %v1340_v20 = vld [vmem:[#allocation5 + $0x130] ss:$8 sps:$4 sm:$0xff]   ;;  %v1344_v21 = vld [vmem:[#allocation5 + $0x124] ss:$8 sps:$4 sm:$0xff]   ;;  %v1343_v22 = vld [vmem:[#allocation5 + $0x20] ss:$8 sps:$4 sm:$0xff]  }
  0x2e   :  { %819 = vmatprep.subr.bf16.mxu1 %v1326_v10  ;;  %v1347_v23 = vld [vmem:[#allocation5 + $0x14] ss:$8 sps:$4 sm:$0xff]   ;;  %v1346_v24 = vld [vmem:[#allocation5 + $0x120] ss:$8 sps:$4 sm:$0xff]   ;;  %v1349_v26 = vld [vmem:[#allocation5 + $0x10] ss:$8 sps:$4 sm:$0xff]  }
  0x2f   :  { %v1350_v25 = vld [vmem:[#allocation5 + $0x114] ss:$8 sps:$4 sm:$0xff]   ;;  %v1353_v27 = vld [vmem:[#allocation5 + $0x4] ss:$8 sps:$4 sm:$0xff]   ;;  %v1352_v28 = vld [vmem:[#allocation5 + $0x110] ss:$8 sps:$4 sm:$0xff]  }
  0x30   :  { %779 = vmatpush1.bf16.msra.mxu0 %v1325_v9  ;;  %v1356_v29 = vld [vmem:[#allocation5 + $0x104] ss:$8 sps:$4 sm:$0xff]   ;;  %v1355_v30 = vld [vmem:[#allocation5] ss:$8 sps:$4 sm:$0xff]   ;;  %v1359_v31 = vld [vmem:[#allocation5 + $0xf4] ss:$8 sps:$4 sm:$0xff]  }
  0x31   :  { %780 = vmatprep.subr.bf16.mxu0 %v1329_v11  ;;  %820 = vmatpush1.bf16.msra.mxu1 %v1328_v12  ;;  %v1358_v32 = vld [vmem:[#allocation5 + $0x100] ss:$8 sps:$4 sm:$0xff]   ;;  %v1362_v33 = vld [vmem:[#allocation5 + $0x1f4] ss:$8 sps:$4 sm:$0xff]   ;;  %v1361_v34 = vld [vmem:[#allocation5 + $0xf0] ss:$8 sps:$4 sm:$0xff]  }
  0x32   :  { %821 = vmatprep.subr.bf16.mxu1 %v1332_v13  ;;  %v1365_v35 = vld [vmem:[#allocation5 + $0xe4] ss:$8 sps:$4 sm:$0xff]   ;;  %v1364_v36 = vld [vmem:[#allocation5 + $0x1f0] ss:$8 sps:$4 sm:$0xff]   ;;  %v1367_v38 = vld [vmem:[#allocation5 + $0xe0] ss:$8 sps:$4 sm:$0xff]  }
  0x33   :  { %v1368_v37 = vld [vmem:[#allocation5 + $0x1e4] ss:$8 sps:$4 sm:$0xff]   ;;  %v1371_v39 = vld [vmem:[#allocation5 + $0xd4] ss:$8 sps:$4 sm:$0xff]   ;;  %v1370_v40 = vld [vmem:[#allocation5 + $0x1e0] ss:$8 sps:$4 sm:$0xff]  }
  0x34   :  { %781 = vmatpush1.bf16.msra.mxu0 %v1331_v14  ;;  %v1374_v41 = vld [vmem:[#allocation5 + $0x1d4] ss:$8 sps:$4 sm:$0xff]   ;;  %v1373_v42 = vld [vmem:[#allocation5 + $0xd0] ss:$8 sps:$4 sm:$0xff]   ;;  %v1377_v43 = vld [vmem:[#allocation5 + $0xc4] ss:$8 sps:$4 sm:$0xff]  }
  0x35   :  { %782 = vmatprep.subr.bf16.mxu0 %v1335_v15  ;;  %822 = vmatpush1.bf16.msra.mxu1 %v1334_v16  ;;  %v1376_v44 = vld [vmem:[#allocation5 + $0x1d0] ss:$8 sps:$4 sm:$0xff]   ;;  %v1380_v45 = vld [vmem:[#allocation5 + $0x1c4] ss:$8 sps:$4 sm:$0xff]   ;;  %v1379_v47 = vld [vmem:[#allocation5 + $0xc0] ss:$8 sps:$4 sm:$0xff]  }
  0x36   :  { %823 = vmatprep.subr.bf16.mxu1 %v1338_v17  ;;  %v61_v46 = vld [vmem:[#allocation2] sm:$0xff]  ;;  %v1383_v49 = vld [vmem:[#allocation5 + $0xb4] ss:$8 sps:$4 sm:$0xff]   ;;  %v62_v50 = vld [vmem:[#allocation2 + $0x8] sm:$0xff]  ;;  %v1599_v15 = vmov 0   ;;  %s1600_s12 = smov [#allocation8]  }
  0x37   :  { %v1145_v48 = vcombine.high %v61_v46, %v61_v46  ;;  %v1382_v51 = vld [vmem:[#allocation5 + $0x1c0] ss:$8 sps:$4 sm:$0xff]   ;;  %v1147_v52 = vcombine.high %v62_v50, %v62_v50  ;;  %v1386_v53 = vld [vmem:[#allocation5 + $0x1b4] ss:$8 sps:$4 sm:$0xff]   ;;  %v1385_v54 = vld [vmem:[#allocation5 + $0xb0] ss:$8 sps:$4 sm:$0xff]   ;;  %v1144_v5 = vcombine.low %v61_v46, %v61_v46  ;;  %v1146_v8 = vcombine.low %v62_v50, %v62_v50 }
  0x38   :  { %783 = vmatpush1.bf16.msra.mxu0 %v1337_v18  ;;  %v1389_v55 = vld [vmem:[#allocation5 + $0xa4] ss:$8 sps:$4 sm:$0xff]   ;;  %v1388_v56 = vld [vmem:[#allocation5 + $0x1b0] ss:$8 sps:$4 sm:$0xff]   ;;  %v1391_v58 = vld [vmem:[#allocation5 + $0xa0] ss:$8 sps:$4 sm:$0xff]  }
  0x39   :  { %784 = vmatprep.subr.bf16.mxu0 %v1341_v19  ;;  %824 = vmatpush1.bf16.msra.mxu1 %v1340_v20  ;;  %v1392_v57 = vld [vmem:[#allocation5 + $0x1a4] ss:$8 sps:$4 sm:$0xff]   ;;  %v1395_v59 = vld [vmem:[#allocation5 + $0x94] ss:$8 sps:$4 sm:$0xff]   ;;  %v1394_v60 = vld [vmem:[#allocation5 + $0x1a0] ss:$8 sps:$4 sm:$0xff]  }
  0x3a   :  { %825 = vmatprep.subr.bf16.mxu1 %v1344_v21  ;;  %806 = vmatprep.mubr.bf16.mxu0 %v1145_v48  ;;  %v1398_v61 = vld [vmem:[#allocation5 + $0x194] ss:$8 sps:$4 sm:$0xff]   ;;  %v1397_v62 = vld [vmem:[#allocation5 + $0x90] ss:$8 sps:$4 sm:$0xff]   ;;  %v1401_v63 = vld [vmem:[#allocation5 + $0x84] ss:$8 sps:$4 sm:$0xff]  }
  0x3b   :  { %847 = vmatprep.mubr.bf16.mxu1 %v1147_v52  ;;  %v1400_v0 = vld [vmem:[#allocation5 + $0x190] ss:$8 sps:$4 sm:$0xff]   ;;  %v1404_v1 = vld [vmem:[#allocation5 + $0x184] ss:$8 sps:$4 sm:$0xff]   ;;  %v1403_v2 = vld [vmem:[#allocation5 + $0x80] ss:$8 sps:$4 sm:$0xff]  }
  0x3c   :  { %785 = vmatpush1.bf16.msra.mxu0 %v1343_v22  ;;  %v1411_v3 = vld [vmem:[#allocation5 + $0x274] ss:$8 sps:$4 sm:$0xff]   ;;  %v1408_v4 = vld [vmem:[#allocation5 + $0x180] ss:$8 sps:$4 sm:$0xff]   ;;  %v1409_v7 = vld [vmem:[#allocation5 + $0x270] ss:$8 sps:$4 sm:$0xff]  }
  0x3d   :  { %786 = vmatprep.subr.bf16.mxu0 %v1347_v23  ;;  %826 = vmatpush1.bf16.msra.mxu1 %v1346_v24  ;;  %v1437_v6 = vld [vmem:[#allocation5 + $0x374] ss:$8 sps:$4 sm:$0xff]   ;;  %v1416_v9 = vld [vmem:[#allocation5 + $0x264] ss:$8 sps:$4 sm:$0xff]   ;;  %v1435_v10 = vld [vmem:[#allocation5 + $0x370] ss:$8 sps:$4 sm:$0xff]  }
  0x3e   :  { %827 = vmatprep.subr.bf16.mxu1 %v1350_v25  ;;  %v1443_v11 = vld [vmem:[#allocation5 + $0x364] ss:$8 sps:$4 sm:$0xff]   ;;  %v1414_v12 = vld [vmem:[#allocation5 + $0x260] ss:$8 sps:$4 sm:$0xff]   ;;  %v1419_v13 = vld [vmem:[#allocation5 + $0x254] ss:$8 sps:$4 sm:$0xff]  }
  0x3f   :  { %v1441_v14 = vld [vmem:[#allocation5 + $0x360] ss:$8 sps:$4 sm:$0xff]   ;;  %v1449_v16 = vld [vmem:[#allocation5 + $0x354] ss:$8 sps:$4 sm:$0xff]   ;;  %v1417_v17 = vld [vmem:[#allocation5 + $0x250] ss:$8 sps:$4 sm:$0xff]  }
  0x40   :  { %787 = vmatpush1.bf16.msra.mxu0 %v1349_v26  ;;  %v1422_v18 = vld [vmem:[#allocation5 + $0x244] ss:$8 sps:$4 sm:$0xff]   ;;  %v1420_v19 = vld [vmem:[#allocation5 + $0x240] ss:$8 sps:$4 sm:$0xff]   ;;  %v1447_v20 = vld [vmem:[#allocation5 + $0x350] ss:$8 sps:$4 sm:$0xff]  }
  0x41   :  { %788 = vmatprep.subr.bf16.mxu0 %v1353_v27  ;;  %828 = vmatpush1.bf16.msra.mxu1 %v1352_v28  ;;  %v1455_v21 = vld [vmem:[#allocation5 + $0x344] ss:$8 sps:$4 sm:$0xff]   ;;  %v1425_v22 = vld [vmem:[#allocation5 + $0x234] ss:$8 sps:$4 sm:$0xff]   ;;  %v1453_v23 = vld [vmem:[#allocation5 + $0x340] ss:$8 sps:$4 sm:$0xff]  }
  0x42   :  { %829 = vmatprep.subr.bf16.mxu1 %v1356_v29  ;;  %v1461_v24 = vld [vmem:[#allocation5 + $0x334] ss:$8 sps:$4 sm:$0xff]   ;;  %v1423_v26 = vld [vmem:[#allocation5 + $0x230] ss:$8 sps:$4 sm:$0xff]   ;;  %v1428_v28 = vld [vmem:[#allocation5 + $0x224] ss:$8 sps:$4 sm:$0xff]  }
  0x43   :  { %v1640_v25 = vld [vmem:[#allocation2 + $0x10] sm:$0xff]  ;;  %v1458_v48 = vld [vmem:[#allocation5 + $0x2c4] ss:$8 sps:$4 sm:$0xff]   ;;  %s1134_s13 = sshll.u32 %s1600_s12, 4  ;;  %s1135_s13 = int_to_ptr.vmem [resolvable:$true] %s1134_s13 }
  0x44   :  { %789 = vmatpush1.bf16.msra.mxu0 %v1355_v30  ;;  %v1149_v27 = vcombine.high %v1640_v25, %v1640_v25  ;;  %v1459_v29 = vld [vmem:[#allocation5 + $0x330] ss:$8 sps:$4 sm:$0xff]   ;;  %v1467_v30 = vld [vmem:[#allocation5 + $0x324] ss:$8 sps:$4 sm:$0xff]   ;;  %v1452_v46 = vld [vmem:[#allocation5 + $0x2d4] ss:$8 sps:$4 sm:$0xff]   ;;  %p1571_p2 = scmp.lt.s32.totalorder %s1135_s13, %s1135_s13 }
  0x45   :  { %790 = vmatprep.subr.bf16.mxu0 %v1359_v31  ;;  %830 = vmatpush1.bf16.msra.mxu1 %v1358_v32  ;;  %v1426_v31 = vld [vmem:[#allocation5 + $0x220] ss:$8 sps:$4 sm:$0xff]   ;;  %v1431_v32 = vld [vmem:[#allocation5 + $0x214] ss:$8 sps:$4 sm:$0xff]   ;;  %v1470_v52 = vld [vmem:[#allocation5 + $0x2a4] ss:$8 sps:$4 sm:$0xff]  }
  0x46   :  { %831 = vmatprep.subr.bf16.mxu1 %v1362_v33  ;;  %v1465_v33 = vld [vmem:[#allocation5 + $0x320] ss:$8 sps:$4 sm:$0xff]   ;;  %v1464_v50 = vld [vmem:[#allocation5 + $0x2b4] ss:$8 sps:$4 sm:$0xff]  }
  0x48   :  { %791 = vmatpush2.bf16.msra.mxu0 %v1361_v34  ;;  %v1473_v34 = vld [vmem:[#allocation5 + $0x314] ss:$8 sps:$4 sm:$0xff]  }
  0x49   :  { %792 = vmatprep.subr.bf16.mxu0 %v1365_v35  ;;  %832 = vmatpush2.bf16.msra.mxu1 %v1364_v36  ;;  %v1429_v35 = vld [vmem:[#allocation5 + $0x210] ss:$8 sps:$4 sm:$0xff]   ;;  %v1434_v36 = vld [vmem:[#allocation5 + $0x204] ss:$8 sps:$4 sm:$0xff]  }
  0x4a   :  { %833 = vmatprep.subr.bf16.mxu1 %v1368_v37  ;;  %v1471_v37 = vld [vmem:[#allocation5 + $0x310] ss:$8 sps:$4 sm:$0xff]  }
  0x4c   :  { %793 = vmatpush2.bf16.msra.mxu0 %v1367_v38  ;;  %v1479_v38 = vld [vmem:[#allocation5 + $0x304] ss:$8 sps:$4 sm:$0xff]  }
  0x4d   :  { %794 = vmatprep.subr.bf16.mxu0 %v1371_v39  ;;  %834 = vmatpush2.bf16.msra.mxu1 %v1370_v40  ;;  %v1432_v39 = vld [vmem:[#allocation5 + $0x200] ss:$8 sps:$4 sm:$0xff]   ;;  %v1440_v40 = vld [vmem:[#allocation5 + $0x2f4] ss:$8 sps:$4 sm:$0xff]  }
  0x4e   :  { %835 = vmatprep.subr.bf16.mxu1 %v1374_v41  ;;  %v1477_v41 = vld [vmem:[#allocation5 + $0x300] ss:$8 sps:$4 sm:$0xff]  }
  0x50   :  { %795 = vmatpush2.bf16.msra.mxu0 %v1373_v42  ;;  %v1438_v42 = vld [vmem:[#allocation5 + $0x2f0] ss:$8 sps:$4 sm:$0xff]  }
  0x51   :  { %796 = vmatprep.subr.bf16.mxu0 %v1377_v43  ;;  %836 = vmatpush2.bf16.msra.mxu1 %v1376_v44  ;;  %v1446_v43 = vld [vmem:[#allocation5 + $0x2e4] ss:$8 sps:$4 sm:$0xff]   ;;  %v1483_v44 = vld [vmem:[#allocation2 + $0x18] ss:$0 sps:$4 sm:$0xff]  }
  0x52   :  { %837 = vmatprep.subr.bf16.mxu1 %v1380_v45  ;;  %v1444_v45 = vld [vmem:[#allocation5 + $0x2e0] ss:$8 sps:$4 sm:$0xff]  }
  0x54   :  { %797 = vmatpush2.bf16.msra.mxu0 %v1379_v47  ;;  %v1450_v47 = vld [vmem:[#allocation5 + $0x2d0] ss:$8 sps:$4 sm:$0xff]  }
  0x55   :  { %798 = vmatprep.subr.bf16.mxu0 %v1383_v49  ;;  %838 = vmatpush2.bf16.msra.mxu1 %v1382_v51  ;;  %v1456_v49 = vld [vmem:[#allocation5 + $0x2c0] ss:$8 sps:$4 sm:$0xff]   ;;  %v1462_v51 = vld [vmem:[#allocation5 + $0x2b0] ss:$8 sps:$4 sm:$0xff]  }
  0x56   :  { %839 = vmatprep.subr.bf16.mxu1 %v1386_v53  ;;  %v1468_v53 = vld [vmem:[#allocation5 + $0x2a0] ss:$8 sps:$4 sm:$0xff]  }
  0x58   :  { %799 = vmatpush2.bf16.msra.mxu0 %v1385_v54  ;;  %v1476_v54 = vld [vmem:[#allocation5 + $0x294] ss:$8 sps:$4 sm:$0xff]  }
  0x59   :  { %800 = vmatprep.subr.bf16.mxu0 %v1389_v55  ;;  %840 = vmatpush2.bf16.msra.mxu1 %v1388_v56  ;;  %v1474_v55 = vld [vmem:[#allocation5 + $0x290] ss:$8 sps:$4 sm:$0xff]   ;;  %v1482_v56 = vld [vmem:[#allocation5 + $0x284] ss:$8 sps:$4 sm:$0xff]  }
  0x5a   :  { %841 = vmatprep.subr.bf16.mxu1 %v1392_v57  ;;  %v1480_v57 = vld [vmem:[#allocation5 + $0x280] ss:$8 sps:$4 sm:$0xff]  }
  0x5c   :  { %801 = vmatpush2.bf16.msra.mxu0 %v1391_v58  ;;  %v1148_v58 = vcombine.low %v1640_v25, %v1640_v25 }
  0x5d   :  { %802 = vmatprep.subr.bf16.mxu0 %v1395_v59  ;;  %842 = vmatpush2.bf16.msra.mxu1 %v1394_v60  ;;  %v1486_v59 = vld [vmem:[#allocation7 + $0x78] sm:$0xff]  }
  0x5e   :  { %843 = vmatprep.subr.bf16.mxu1 %v1398_v61  ;;  %v1487_v60 = vld [vmem:[#allocation7 + $0x38] sm:$0xff]   ;;  %v1488_v61 = vld [vmem:[#allocation7 + $0x70] sm:$0xff]  }
  0x60   :  { %803 = vmatpush2.bf16.msra.mxu0 %v1397_v62  ;;  %v1489_v62 = vld [vmem:[#allocation7 + $0x30] sm:$0xff]  }
  0x61   :  { %804 = vmatprep.subr.bf16.mxu0 %v1401_v63  ;;  %844 = vmatpush2.bf16.msra.mxu1 %v1400_v0  ;;  %v1490_v63 = vld [vmem:[#allocation7 + $0x68] sm:$0xff]  }
  0x62   :  { %845 = vmatprep.subr.bf16.mxu1 %v1404_v1  ;;  %v1491_v0 = vld [vmem:[#allocation7 + $0x28] sm:$0xff]   ;;  %v1492_v1 = vld [vmem:[#allocation7 + $0x60] sm:$0xff]  }
  0x64   :  { %805 = vmatpush2.bf16.msra.mxu0 %v1403_v2  ;;  %v1493_v2 = vld [vmem:[#allocation7 + $0x20] sm:$0xff]  }
  0x65   :  { %856 = vmatprep.subr.bf16.mxu0 %v1411_v3  ;;  %846 = vmatpush2.bf16.msra.mxu1 %v1408_v4  ;;  %v1494_v3 = vld [vmem:[#allocation7 + $0x58] sm:$0xff]  }
  0x66   :  { %897 = vmatprep.subr.bf16.mxu1 %v1437_v6  ;;  %v1495_v4 = vld [vmem:[#allocation7 + $0x18] sm:$0xff]   ;;  %v1497_v6 = vld [vmem:[#allocation7 + $0x10] sm:$0xff]  }
  0x67   :  { %807 = vmatmul.mubr.bf16.vlgmr.msra.gmra.mxu0 %v1144_v5  ;;  %v1496_v5 = vld [vmem:[#allocation7 + $0x50] sm:$0xff]  }
  0x68   :  { %857 = vmatpush1.bf16.msra.mxu0 %v1409_v7  ;;  %848 = vmatmul.mubr.bf16.vlgmr.msra.gmra.mxu1 %v1146_v8  ;;  %v1498_v7 = vld [vmem:[#allocation7 + $0x48] sm:$0xff]  }
  0x69   :  { %858 = vmatprep.subr.bf16.mxu0 %v1416_v9  ;;  %898 = vmatpush1.bf16.msra.mxu1 %v1435_v10  ;;  %v1499_v8 = vld [vmem:[#allocation7 + $0x8] sm:$0xff]   ;;  %v1500_v9 = vld [vmem:[#allocation7 + $0x40] sm:$0xff]  }
  0x6a   :  { %929 = vmatprep.mubr.bf16.mxu1 %v1599_v15  ;;  %899 = vmatprep.subr.bf16.mxu1 %v1443_v11  ;;  %v1501_v10 = vld [vmem:[#allocation7] sm:$0xff]  }
  0x6b   :  { %888 = vmatprep.mubr.bf16.mxu0 %v1149_v27 }
  0x6c   :  { %859 = vmatpush1.bf16.msra.mxu0 %v1414_v12 }
  0x6d   :  { %860 = vmatprep.subr.bf16.mxu0 %v1419_v13  ;;  %900 = vmatpush1.bf16.msra.mxu1 %v1441_v14 }
  0x6e   :  { %901 = vmatprep.subr.bf16.mxu1 %v1449_v16 }
  0x70   :  { %861 = vmatpush1.bf16.msra.mxu0 %v1417_v17 }
  0x71   :  { %862 = vmatprep.subr.bf16.mxu0 %v1422_v18  ;;  %902 = vmatpush1.bf16.msra.mxu1 %v1447_v20 }
  0x72   :  { %903 = vmatprep.subr.bf16.mxu1 %v1455_v21 }
  0x74   :  { %863 = vmatpush1.bf16.msra.mxu0 %v1420_v19 }
  0x75   :  { %864 = vmatprep.subr.bf16.mxu0 %v1425_v22  ;;  %904 = vmatpush1.bf16.msra.mxu1 %v1453_v23  ;;  %v179_v23 = vlaneseq }
  0x76   :  { %905 = vmatprep.subr.bf16.mxu1 %v1461_v24 }
  0x77   :  { %v180_v24 = vshrl.u32 %v179_v23, 7 }
  0x78   :  { %865 = vmatpush1.bf16.msra.mxu0 %v1423_v26  ;;  %v177_v26 = vld [vmem:[%s1657_s2] sm:$0x3] }
  0x79   :  { %866 = vmatprep.subr.bf16.mxu0 %v1428_v28  ;;  %906 = vmatpush1.bf16.msra.mxu1 %v1459_v29  ;;  %v181_v25 = vsub.s32 0, %v180_v24  ;;  %v185_v27 = vsub.s32 1, %v180_v24 }
  0x7a   :  { %907 = vmatprep.subr.bf16.mxu1 %v1467_v30 }
  0x7b   :  { %v182_v28 = vrot.slane %v177_v26, %v181_v25  ;;  %v186_v29 = vrot.slane %v177_v26, %v185_v27 }
  0x7c   :  { %867 = vmatpush1.bf16.msra.mxu0 %v1426_v31 }
  0x7d   :  { %868 = vmatprep.subr.bf16.mxu0 %v1431_v32  ;;  %908 = vmatpush1.bf16.msra.mxu1 %v1465_v33 }
  0x7e   :  { %909 = vmatprep.subr.bf16.mxu1 %v1473_v34 }
  0x80   :  { %869 = vmatpush1.bf16.msra.mxu0 %v1429_v35 }
  0x81   :  { %870 = vmatprep.subr.bf16.mxu0 %v1434_v36  ;;  %910 = vmatpush1.bf16.msra.mxu1 %v1471_v37 }
  0x82   :  { %911 = vmatprep.subr.bf16.mxu1 %v1479_v38 }
  0x84   :  { %871 = vmatpush1.bf16.msra.mxu0 %v1432_v39 }
  0x85   :  { %872 = vmatprep.subr.bf16.mxu0 %v1440_v40  ;;  %912 = vmatpush1.bf16.msra.mxu1 %v1477_v41 }
  0x86   :  { %1280 = vmatprep.subr.bf16.mxu1 %v1486_v59 }
  0x88   :  { %873 = vmatpush2.bf16.msra.mxu0 %v1438_v42  ;;  %930 = vmatmul.mubr.bf16.vlgmr.msra.gmra.mxu1 %v1483_v44 }
  0x89   :  { %874 = vmatprep.subr.bf16.mxu0 %v1446_v43  ;;  %1281 = vmatpush3.bf16.msra.mxu1 %v1487_v60 }
  0x8a   :  { %1282 = vmatprep.subr.bf16.mxu1 %v1488_v61 }
  0x8c   :  { %875 = vmatpush2.bf16.msra.mxu0 %v1444_v45 }
  0x8d   :  { %876 = vmatprep.subr.bf16.mxu0 %v1452_v46  ;;  %1283 = vmatpush3.bf16.msra.mxu1 %v1489_v62 }
  0x8e   :  { %1284 = vmatprep.subr.bf16.mxu1 %v1490_v63 }
  0x90   :  { %877 = vmatpush2.bf16.msra.mxu0 %v1450_v47 }
  0x91   :  { %878 = vmatprep.subr.bf16.mxu0 %v1458_v48  ;;  %1285 = vmatpush3.bf16.msra.mxu1 %v1491_v0  ;;  %v1263_v48 = vld [vmem:[%s1659_s4] ss:$0 sm:$0xff]  ;;  %s1566_s4 = scalar_lea.vmem %s1135_s13, 128 }
  0x92   :  { %1286 = vmatprep.subr.bf16.mxu1 %v1492_v1  ;;  %p1567_p1 = scmp.ne.s32.totalorder %s1135_s13, %s1566_s4  ;;  %p1572_p3 = scmp.lt.s32.totalorder %s1566_s4, %s1566_s4 }
  0x94   :  { %879 = vmatpush2.bf16.msra.mxu0 %v1456_v49  ;;  %p1573_p4 = por %p1572_p3, %p1571_p2 }
  0x95   :  { %880 = vmatprep.subr.bf16.mxu0 %v1464_v50  ;;  %1287 = vmatpush3.bf16.msra.mxu1 %v1493_v2 }
  0x96   :  { %1288 = vmatprep.subr.bf16.mxu1 %v1494_v3  ;;  %p1574_p5 = pnand %p1573_p4, %p1567_p1 }
  0x98   :  { %881 = vmatpush2.bf16.msra.mxu0 %v1462_v51 }
  0x99   :  { %882 = vmatprep.subr.bf16.mxu0 %v1470_v52  ;;  %1289 = vmatpush3.bf16.msra.mxu1 %v1495_v4 }
  0x9a   :  { %1290 = vmatprep.subr.bf16.mxu1 %v1496_v5 }
  0x9c   :  { %883 = vmatpush2.bf16.msra.mxu0 %v1468_v53 }
  0x9d   :  { %884 = vmatprep.subr.bf16.mxu0 %v1476_v54  ;;  %1291 = vmatpush3.bf16.msra.mxu1 %v1497_v6 }
  0x9e   :  { %1292 = vmatprep.subr.bf16.mxu1 %v1498_v7 }
  0xa0   :  { %885 = vmatpush2.bf16.msra.mxu0 %v1474_v55 }
  0xa1   :  { %886 = vmatprep.subr.bf16.mxu0 %v1482_v56  ;;  %1293 = vmatpush3.bf16.msra.mxu1 %v1499_v8 }
  0xa2   :  { %1294 = vmatprep.subr.bf16.mxu1 %v1500_v9 }
  0xa4   :  { %887 = vmatpush2.bf16.msra.mxu0 %v1480_v57 }
  0xa5   :  { %1295 = vmatpush3.bf16.msra.mxu1 %v1501_v10 }
  0xa7   :  { %889 = vmatmul.mubr.bf16.vlgmr.msra.gmra.mxu0 %v1148_v58 }
 0x127   :  { %v808_v11 = vpop.f32.mrf.mxu0 }
 0x128   :  { %v849_v13 = vpop.f32.mrf.mxu1  ;;  %v809_v30 = vadd.f32 %v808_v11, %v182_v28 }
 0x129   :  { %v810_v12 = vpop.f32.mrf.mxu0 }
 0x12a   :  { %v851_v15 = vpop.f32.mrf.mxu1  ;;  %v811_v31 = vadd.f32 %v810_v12, %v186_v29  ;;  %v850_v32 = vadd.f32 %v849_v13, %v809_v30 }
 0x12b   :  { %v812_v14 = vpop.f32.mrf.mxu0 }
 0x12c   :  { %v853_v17 = vpop.f32.mrf.mxu1  ;;  %v852_v34 = vadd.f32 %v851_v15, %v811_v31 }
 0x12d   :  { %v813_v16 = vpop.f32.mrf.mxu0 }
 0x12e   :  { %v854_v18 = vpop.f32.mrf.mxu1 }
 0x148   :  { %v931_v19 = vpop.f32.mrf.mxu1 }
 0x14a   :  { %v933_v20 = vpop.f32.mrf.mxu1 }
 0x14c   :  { %v935_v21 = vpop.f32.mrf.mxu1 }
 0x14e   :  { %v936_v22 = vpop.f32.mrf.mxu1 }
 0x167   :  { %v890_v33 = vpop.f32.mrf.mxu0 }
 0x168   :  { %v891_v35 = vadd.f32 %v890_v33, %v850_v32 }
 0x169   :  { %v892_v36 = vpop.f32.mrf.mxu0 }
 0x16a   :  { %v932_v37 = vadd.f32 %v931_v19, %v891_v35  ;;  %v893_v38 = vadd.f32 %v892_v36, %v852_v34 }
 0x16b   :  { %v894_v39 = vpop.f32.mrf.mxu0 }
 0x16c   :  { %v934_v40 = vadd.f32 %v933_v20, %v893_v38  ;;  %v938_v41 = vmax.f32 %v932_v37, 0.0 }
 0x16d   :  { %v895_v42 = vpop.f32.mrf.mxu0 }
 0x16e   :  { %v939_v43 = vmax.f32 %v934_v40, 0.0  ;;  %v940_v45 = vpack.c.bf16 %v938_v41, %v938_v41 }
 0x170   :  { %v941_v44 = vpack.c.bf16 %v939_v43, %v939_v43 }
 0x172   :  { %1109 = vmatprep.mubr.bf16.mxu1 %v941_v44 }
 0x173   :  { %1110 = vmatmul.mubr.bf16.vlgmr.msra.gmra.mxu1 %v940_v45 }
 0x233   :  { %v1296_v46 = vpop.f32.mrf.mxu1 }
 0x235   :  { %v1297_v47 = vpop.f32.mrf.mxu1 }
 0x236   :  { %v1298_v49 = vadd.f32 %v1297_v47, %v1296_v46 }
 0x237   :  { %v1299_v50 = vpop.f32.mrf.mxu1 }
 0x238   :  { %v1112_v51 = vadd.f32 %v1298_v49, %v1263_v48 }
 0x239   :  { %v1300_v52 = vpop.f32.mrf.mxu1 }
 0x23a   :  { %1117 = vmax.xlane.f32.xlu0 %v1112_v51 }
 0x2c3   :  { %v1118_v53 = vpop.xlane.xlu0 %1117 }
 0x2c4   :  { %v1119_v54 = vsub.f32 %v1112_v51, %v1118_v53 }
 0x2c6   :  { %v1120_v55 = vmul.f32 1.442695, %v1119_v54 }
 0x2c8   :  { %1502 = vpow2.f32 %v1120_v55 }
 0x2d5   :  { %v1503_v56 = vpop.eup %1502 }
 0x2d6   :  { %1122 = vadd.xlane.f32.xlu0 %v1503_v56 }
 0x35f   :  { %v1123_v57 = vpop.xlane.xlu0 %1122 }
 0x360   :  { %1504 = vrcp.f32 %v1123_v57 }
 0x36d   :  { %v1505_v58 = vpop.eup %1504 }
 0x36e   :  { %v1126_v59 = vmul.f32 %v1505_v58, %v1503_v56 }
 0x370   :  { %1127 = vst [vmem:[#allocation8] sm:$0xff] %v1126_v59 }
 0x371   :  { %1577 = shalt.err (!%p1574_p5)
}
 0x372   :  { %1137 = dma.vmem_to_hbm [thread:$0]  %s1135_s13, 128, %s1660_s5, [#allocation4]  }
 0x373   :  { %1590 = dma.done.wait [#allocation4], 128  }
 0x374   :  { %1591 = vsyncadd [#allocation4], 4294967168 }
 0x375   :  { %1141 = vsyncpa [#allocation3], 1 }
 0x376   :  { %1142 = vsyncpa [#allocation6], 1 }
 0x377   :  { %1143 = vsyncpa [#allocation4], 1 }

</bundles_post_ra>
